<compile_context>
chip_gen: v7x
topology: tpu7x:2x2x1
jax: 0.10.0
libtpu: 0.0.40
codegen_flags: <defaults>
</compile_context>

<pallas_src>
import math
import numpy as np
import jax
import jax.numpy as jnp
from jax.experimental import pallas as pl
from jax.experimental.pallas import tpu as pltpu


# ----------------------------------------------------------------------------- helpers
def _round_up(x, m):
    return ((x + m - 1) // m) * m


_TILE_CANDS = (2688, 2304, 2048, 1792, 1536, 1344, 1152, 1024, 896, 768,
               640, 512, 384, 256, 128)
_VMEM_BUDGET = 20 * 1024 * 1024     # double-buffered tile budget (safe on v5e/v6e/v7x)


def _largest_divisor_tile(p, max_tile):
    for c in _TILE_CANDS:
        if c <= max_tile and p % c == 0:
            return c
    return 128


def _choose_tiles(M, Kp, Np):
    tm = 256 if M > 256 else _round_up(M, 8)
    Mp = _round_up(M, tm)
    tn = _largest_divisor_tile(Np, 512)
    # bytes: 2 buffers * bf16 * (tm + tn) per K element; output tile is f32, 2 buffers
    rem = _VMEM_BUDGET - 2 * tm * tn * 4 - 2 * tn * 4
    tk_max = max(128, rem // (4 * (tm + tn)))
    tk = _largest_divisor_tile(Kp, tk_max)
    return tm, Mp, tn, tk


# --------------------------------------------------------------------- Pallas matmul
def pallas_matmul(a, b, bias=None, relu=False):
    """out = maybe_relu(a @ b + bias); bf16 MXU operands, f32 accumulation/output."""
    M, K = a.shape
    K2, N = b.shape
    assert K == K2

    Kp = _round_up(K, 128)
    Np = _round_up(N, 128)
    tm, Mp, tn, tk = _choose_tiles(M, Kp, Np)

    a16 = a.astype(jnp.bfloat16)
    b16 = b.astype(jnp.bfloat16)
    if (Mp, Kp) != (M, K):
        a16 = jnp.pad(a16, ((0, Mp - M), (0, Kp - K)))
    if (Kp, Np) != (K, N):
        b16 = jnp.pad(b16, ((0, Kp - K), (0, Np - N)))
    if bias is None:
        bias = jnp.zeros((N,), jnp.float32)
    bias32 = bias.astype(jnp.float32)
    if Np != N:
        bias32 = jnp.pad(bias32, (0, Np - N))
    bias2d = bias32.reshape(1, Np)

    nk = Kp // tk
    grid = (Mp // tm, Np // tn, nk)

    def kernel(a_ref, b_ref, s_ref, o_ref):
        if nk == 1:
            y = jnp.dot(a_ref[...], b_ref[...],
                        preferred_element_type=jnp.float32) + s_ref[...]
            if relu:
                y = jnp.maximum(y, 0.0)
            o_ref[...] = y
            return

        k = pl.program_id(2)

        @pl.when(k == 0)
        def _():
            o_ref[...] = jnp.zeros_like(o_ref)

        # accumulate directly into the resident output block (no scratch copy)
        o_ref[...] += jnp.dot(a_ref[...], b_ref[...],
                              preferred_element_type=jnp.float32)

        @pl.when(k == nk - 1)
        def _():
            y = o_ref[...] + s_ref[...]
            if relu:
                y = jnp.maximum(y, 0.0)
            o_ref[...] = y

    out = pl.pallas_call(
        kernel,
        out_shape=jax.ShapeDtypeStruct((Mp, Np), jnp.float32),
        grid_spec=pltpu.PrefetchScalarGridSpec(
            num_scalar_prefetch=0,
            grid=grid,
            in_specs=[pl.BlockSpec((tm, tk), lambda i, j, k: (i, k)),
                      pl.BlockSpec((tk, tn), lambda i, j, k: (k, j)),
                      pl.BlockSpec((1, tn), lambda i, j, k: (0, j))],
            out_specs=pl.BlockSpec((tm, tn), lambda i, j, k: (i, j)),
        ),
        compiler_params=pltpu.CompilerParams(
            dimension_semantics=("parallel", "parallel", "arbitrary"),
            vmem_limit_bytes=32 * 1024 * 1024),
    )(a16, b16, bias2d)
    return out[:M, :N]


# --------------------------------------------------------------------- conv via im2col
def _im2col(x, kh, kw, stride, pad):
    N, H, W, C = x.shape
    if pad:
        x = jnp.pad(x, ((0, 0), (pad, pad), (pad, pad), (0, 0)))
    Ho = (H + 2 * pad - kh) // stride + 1
    Wo = (W + 2 * pad - kw) // stride + 1
    cols = []
    for i in range(kh):
        for j in range(kw):
            cols.append(x[:, i:i + stride * (Ho - 1) + 1:stride,
                           j:j + stride * (Wo - 1) + 1:stride, :])
    patches = jnp.concatenate(cols, axis=-1)          # [N, Ho, Wo, kh*kw*C]  (bf16)
    return patches.reshape(N * Ho * Wo, kh * kw * C), (N, Ho, Wo)


def conv2d(x, w, bias=None, stride=1, pad=0, relu=False):
    """x: NHWC, w: [kh, kw, Cin, Cout]."""
    # TODO(synk): fuse im2col into the matmul reduction (shifted-tile reads per
    # (kh,kw) grid step) to avoid materializing the 9x patch tensor in HBM.
    kh, kw, cin, cout = w.shape
    patches, (N, Ho, Wo) = _im2col(x.astype(jnp.bfloat16), kh, kw, stride, pad)
    out = pallas_matmul(patches, w.reshape(kh * kw * cin, cout),
                        bias=bias, relu=relu)
    return out.reshape(N, Ho, Wo, cout)


# ------------------------------------------------------------------ bilinear (PyTorch)
def _bilin_matrix(out_size, in_size):
    o = np.arange(out_size, dtype=np.float64)
    src = np.maximum((o + 0.5) * (in_size / out_size) - 0.5, 0.0)
    i0 = np.minimum(np.floor(src).astype(np.int64), in_size - 1)
    i1 = np.minimum(i0 + 1, in_size - 1)
    w1 = src - i0
    w0 = 1.0 - w1
    A = np.zeros((out_size, in_size), dtype=np.float32)
    A[np.arange(out_size), i0] += w0
    A[np.arange(out_size), i1] += w1
    return A


def bilinear_resize(x, out_hw):
    """F.interpolate(mode='bilinear', align_corners=False) on NHWC — separable."""
    B, H, W, C = x.shape
    Ho, Wo = out_hw
    if (Ho, Wo) == (H, W):
        return x
    if Ho != H:
        Ah = jnp.asarray(_bilin_matrix(Ho, H))                      # [Ho, H]
        xt = x.transpose(1, 0, 2, 3).reshape(H, B * W * C)
        y = pallas_matmul(Ah, xt)                                   # [Ho, B*W*C]
        x = y.reshape(Ho, B, W, C).transpose(1, 0, 2, 3)
    if Wo != W:
        Aw = jnp.asarray(_bilin_matrix(Wo, W))                      # [Wo, W]
        xt = x.transpose(2, 0, 1, 3).reshape(W, B * Ho * C)
        y = pallas_matmul(Aw, xt)                                   # [Wo, B*Ho*C]
        x = y.reshape(Wo, B, Ho, C).transpose(1, 2, 0, 3)
    return x


# ---------------------------------------------------------- BatchNorm(train) + ReLU
def _bn_stats_kernel(x_ref, sum_ref, sq_ref):
    @pl.when(pl.program_id(0) == 0)
    def _():
        sum_ref[...] = jnp.zeros_like(sum_ref)
        sq_ref[...] = jnp.zeros_like(sq_ref)

    x = x_ref[...]
    sum_ref[...] += jnp.sum(x, axis=0, keepdims=True)
    sq_ref[...] += jnp.sum(x * x, axis=0, keepdims=True)


def _bn_apply_kernel(x_ref, scale_ref, shift_ref, o_ref):
    o_ref[...] = jnp.maximum(x_ref[...] * scale_ref[...] + shift_ref[...], 0.0)


def bn_relu(x, gamma, beta):
    # Training-mode (batch) statistics, matching nn.BatchNorm2d default train().
    N, H, W, C = x.shape
    M = N * H * W
    xf = x.reshape(M, C).astype(jnp.float32)
    tm = 512 if M >= 512 else _round_up(M, 8)
    Mp = _round_up(M, tm)
    if Mp != M:
        xf = jnp.pad(xf, ((0, Mp - M), (0, 0)))     # zero rows don't affect sum/sumsq

    s, sq = pl.pallas_call(
        _bn_stats_kernel,
        out_shape=(jax.ShapeDtypeStruct((1, C), jnp.float32),
                   jax.ShapeDtypeStruct((1, C), jnp.float32)),
        grid=(Mp // tm,),
        in_specs=[pl.BlockSpec((tm, C), lambda i: (i, 0))],
        out_specs=(pl.BlockSpec((1, C), lambda i: (0, 0)),
                   pl.BlockSpec((1, C), lambda i: (0, 0))),
        compiler_params=pltpu.CompilerParams(dimension_semantics=("arbitrary",)),
    )(xf)

    mean = s / M
    var = sq / M - mean * mean                       # biased, like PyTorch forward
    scale = gamma.reshape(1, C) * jax.lax.rsqrt(var + 1e-5)
    shift = beta.reshape(1, C) - mean * scale

    out = pl.pallas_call(
        _bn_apply_kernel,
        out_shape=jax.ShapeDtypeStruct((Mp, C), jnp.float32),
        grid=(Mp // tm,),
        in_specs=[pl.BlockSpec((tm, C), lambda i: (i, 0)),
                  pl.BlockSpec((1, C), lambda i: (0, 0)),
                  pl.BlockSpec((1, C), lambda i: (0, 0))],
        out_specs=pl.BlockSpec((tm, C), lambda i: (i, 0)),
        compiler_params=pltpu.CompilerParams(dimension_semantics=("parallel",)),
    )(xf, scale, shift)
    return out[:M].reshape(N, H, W, C)


# --------------------------------------------------------------- softmax + argmax
def _softmax_argmax_kernel(x_ref, p_ref, l_ref):
    x = x_ref[...]
    m = jnp.max(x, axis=-1, keepdims=True)
    e = jnp.exp(x - m)
    s = jnp.sum(e, axis=-1, keepdims=True)
    p_ref[...] = e / s
    idx = jax.lax.broadcasted_iota(jnp.int32, x.shape, 1)
    cand = jnp.where(x == m, idx, jnp.int32(2 ** 30))
    l_ref[...] = jnp.min(cand, axis=-1, keepdims=True)


def softmax_argmax(logits_nhwc):
    N, H, W, C = logits_nhwc.shape
    M = N * H * W
    tm = 512 if M >= 512 else _round_up(M, 8)
    Mp = _round_up(M, tm)
    x = logits_nhwc.reshape(M, C).astype(jnp.float32)
    if Mp != M:
        x = jnp.pad(x, ((0, Mp - M), (0, 0)))
    prob, label = pl.pallas_call(
        _softmax_argmax_kernel,
        out_shape=(jax.ShapeDtypeStruct((Mp, C), jnp.float32),
                   jax.ShapeDtypeStruct((Mp, 1), jnp.int32)),
        grid=(Mp // tm,),
        in_specs=[pl.BlockSpec((tm, C), lambda i: (i, 0))],
        out_specs=(pl.BlockSpec((tm, C), lambda i: (i, 0)),
                   pl.BlockSpec((tm, 1), lambda i: (i, 0))),
        compiler_params=pltpu.CompilerParams(dimension_semantics=("parallel",)),
    )(x)
    prob = prob[:M].reshape(N, H, W, C)
    label = label[:M, 0].reshape(N, H, W)
    return prob, label


# ------------------------------------------------------------------------ parameters
def _conv_w(key, kh, kw, cin, cout):
    std = 1.0 / math.sqrt(kh * kw * cin)
    return jax.random.normal(key, (kh, kw, cin, cout), jnp.float32) * std


def init_params(key, num_classes):
    ks = jax.random.split(key, 16)
    params = {
        # TODO(synk): densenet_cosine_264_k32 pretrained encoder is an external module
        # not defined in the reference file; it is substituted by a deterministic conv
        # stack producing the channel counts / strides the decoder expects
        # (skip features: 256ch @ /4, 1152ch @ /8; encoder output: 2688ch @ /16).
        'enc1_w': _conv_w(ks[0], 3, 3, 3, 64),
        'enc2_w': _conv_w(ks[1], 3, 3, 64, 256),
        'enc3_w': _conv_w(ks[2], 3, 3, 256, 1152),
        'enc4_w': _conv_w(ks[3], 1, 1, 1152, 2688),
        # PSP branch: 4 x Conv2d(2688, 1024, k=3, p=1, bias=True)
        'psp_w': [_conv_w(ks[4 + i], 3, 3, 2688, 1024) for i in range(4)],
        'psp_b': [jnp.zeros((1024,), jnp.float32) for _ in range(4)],
        # PSPSqueeze: Conv2d(4096, 512, 1x1, bias=False) + BN + ReLU
        'pspsq_w': _conv_w(ks[8], 1, 1, 4096, 512),
        'pspsq_g': jnp.ones((512,), jnp.float32),
        'pspsq_beta': jnp.zeros((512,), jnp.float32),
        # SkipConnections: Conv2d(1152,512,1x1)+BN+ReLU ; Conv2d(256,256,1x1)+BN+ReLU
        'skip_w': [_conv_w(ks[9], 1, 1, 1152, 512), _conv_w(ks[10], 1, 1, 256, 256)],
        'skip_g': [jnp.ones((512,), jnp.float32), jnp.ones((256,), jnp.float32)],
        'skip_beta': [jnp.zeros((512,), jnp.float32), jnp.zeros((256,), jnp.float32)],
        # SqueezeUpsample: Conv2d(1024,512,1x1)+BN+ReLU ; Conv2d(768,256,1x1)+BN+ReLU
        'sq_w': [_conv_w(ks[11], 1, 1, 1024, 512), _conv_w(ks[12], 1, 1, 768, 256)],
        'sq_g': [jnp.ones((512,), jnp.float32), jnp.ones((256,), jnp.float32)],
        'sq_beta': [jnp.zeros((512,), jnp.float32), jnp.zeros((256,), jnp.float32)],
        # FinalPrediction: Conv2d(256, NumClasses, k=3, p=1, bias=False)
        'final_w': _conv_w(ks[13], 3, 3, 256, num_classes),
    }
    return params


# --------------------------------------------------------------------------- forward
def net_forward(images_nhwc, params):
    """images_nhwc: [B, H, W, 3] (same convention as the PyTorch module's `Images`)."""
    rgb_mean = jnp.array([123.68, 116.779, 103.939], jnp.float32)
    rgb_std = jnp.array([65.0, 65.0, 65.0], jnp.float32)
    x = (images_nhwc.astype(jnp.float32) - rgb_mean) / rgb_std

    # ---- (synthetic) encoder, producing the two skip features used by forward ----
    x = conv2d(x, params['enc1_w'], stride=2, pad=1, relu=True)            # [B,H/2, W/2,  64]
    feat28 = conv2d(x, params['enc2_w'], stride=2, pad=1, relu=True)       # [B,H/4, W/4, 256]
    feat96 = conv2d(feat28, params['enc3_w'], stride=2, pad=1, relu=True)  # [B,H/8,W/8,1152]
    x = conv2d(feat96, params['enc4_w'], stride=2, pad=0, relu=True)       # [B,H/16,W/16,2688]

    # ---- PSP ----
    B, Hp, Wp, _ = x.shape
    psp_size = (Hp, Wp)
    psp_scales = [1, 1 / 2, 1 / 4, 1 / 8]
    psp_feats = []
    for i, s in enumerate(psp_scales):
        new_size = (int(math.ceil(Hp * s)), int(math.ceil(Wp * s)))
        y = bilinear_resize(x, new_size)
        y = conv2d(y, params['psp_w'][i], bias=params['psp_b'][i], stride=1, pad=1)
        y = bilinear_resize(y, psp_size)
        psp_feats.append(y)
    x = jnp.concatenate(psp_feats, axis=-1)                                # 4096 ch

    x = conv2d(x, params['pspsq_w'], stride=1, pad=0)
    x = bn_relu(x, params['pspsq_g'], params['pspsq_beta'])                # 512 ch

    # ---- skip connections / upsampling ----
    skips = [feat96, feat28]
    for i in range(2):
        sk = skips[i]
        sp = (sk.shape[1], sk.shape[2])
        x = bilinear_resize(x, sp)
        s = conv2d(sk, params['skip_w'][i], stride=1, pad=0)
        s = bn_relu(s, params['skip_g'][i], params['skip_beta'][i])
        x = jnp.concatenate([s, x], axis=-1)
        x = conv2d(x, params['sq_w'][i], stride=1, pad=0)
        x = bn_relu(x, params['sq_g'][i], params['sq_beta'][i])

    # ---- final prediction head ----
    x = conv2d(x, params['final_w'], stride=1, pad=1)                      # [B,H/4,W/4,NC]
    x = bilinear_resize(x, (images_nhwc.shape[1], images_nhwc.shape[2]))   # [B,H,W,NC]

    prob_nhwc, labels = softmax_argmax(x)
    prob = jnp.transpose(prob_nhwc, (0, 3, 1, 2))                          # NCHW like PyTorch
    return prob, labels


# ------------------------------------------------------------------------------ main
if __name__ == "__main__":
    NUM_CLASSES = 4
    B, H, W = 2, 64, 64

    key = jax.random.PRNGKey(0)
    k_img, k_par = jax.random.split(key)
    images = jax.random.uniform(k_img, (B, H, W, 3), jnp.float32,
                                minval=0.0, maxval=255.0)
    params = init_params(k_par, NUM_CLASSES)

    prob, labels = net_forward(images, params)
    prob = jax.block_until_ready(prob)
    labels = jax.block_until_ready(labels)

    assert prob.shape == (B, NUM_CLASSES, H, W)
    assert labels.shape == (B, H, W)
    assert bool(jnp.all(jnp.isfinite(prob)))
    # softmax rows sum to 1
    assert bool(jnp.allclose(jnp.sum(prob, axis=1), 1.0, atol=1e-3))
    print("KERNEL_OK")
</pallas_src>

<mosaic_0001>
module attributes {stable_mosaic.version = 11 : i64} {
  func.func @kernel(%arg0: i32, %arg1: i32, %arg2: i32, %arg3: memref<256x128xbf16, #tpu.memory_space<vmem>>, %arg4: memref<128x128xbf16, #tpu.memory_space<vmem>>, %arg5: memref<1x128xf32, #tpu.memory_space<vmem>>, %arg6: memref<256x128xf32, #tpu.memory_space<vmem>>) attributes {dimension_semantics = [#tpu.dimension_semantics<parallel>, #tpu.dimension_semantics<parallel>, #tpu.dimension_semantics<arbitrary>], iteration_bounds = array<i64: 8, 1, 1>, scalar_prefetch = 0 : i64, scratch_operands = 0 : i64, tpu.core_type = #tpu.core_type<tc>, window_params = [{transform_indices = @transform_0, window_bounds = array<i64: 256, 128>}, {transform_indices = @transform_1, window_bounds = array<i64: 128, 128>}, {transform_indices = @transform_2, window_bounds = array<i64: 1, 128>}, {transform_indices = @transform_3, window_bounds = array<i64: 256, 128>}]} {
    %c0 = arith.constant 0 : index
    %c0_0 = arith.constant 0 : index
    %0 = vector.load %arg3[%c0, %c0_0] : memref<256x128xbf16, #tpu.memory_space<vmem>>, vector<256x128xbf16>
    %c0_1 = arith.constant 0 : index
    %c0_2 = arith.constant 0 : index
    %1 = vector.load %arg4[%c0_1, %c0_2] : memref<128x128xbf16, #tpu.memory_space<vmem>>, vector<128x128xbf16>
    %cst = arith.constant dense<0.000000e+00> : vector<256x128xf32>
    %2 = tpu.matmul %0, %1, %cst {dimension_numbers = #tpu.dot_dimension_numbers<[1], [0], [0], [1], [0, 0, 1, 1], [], []>} : vector<256x128xbf16>, vector<128x128xbf16>, vector<256x128xf32> -> vector<256x128xf32>
    %c0_3 = arith.constant 0 : index
    %c0_4 = arith.constant 0 : index
    %3 = vector.load %arg5[%c0_3, %c0_4] : memref<1x128xf32, #tpu.memory_space<vmem>>, vector<1x128xf32>
    %4 = vector.broadcast %3 : vector<1x128xf32> to vector<256x128xf32>
    %5 = arith.addf %2, %4 : vector<256x128xf32>
    %cst_5 = arith.constant 0.000000e+00 : f32
    %6 = vector.broadcast %cst_5 : f32 to vector<256x128xf32>
    %7 = arith.maximumf %5, %6 : vector<256x128xf32>
    %c0_6 = arith.constant 0 : index
    %c0_7 = arith.constant 0 : index
    %8 = vector.load %arg6[%c0_6, %c0_7] : memref<256x128xf32, #tpu.memory_space<vmem>>, vector<256x128xf32>
    tpu.vector_store %arg6[%c0_6, %c0_7], %7 {strides = array<i32>} : memref<256x128xf32, #tpu.memory_space<vmem>>, vector<256x128xf32>,
    return
  }
  func.func @transform_0(%arg0: i32, %arg1: i32, %arg2: i32) -> (i32, i32) {
    %c0_i32 = arith.constant 0 : i32
    return %arg0, %arg2 : i32, i32
  }
  func.func @transform_1(%arg0: i32, %arg1: i32, %arg2: i32) -> (i32, i32) {
    %c0_i32 = arith.constant 0 : i32
    return %arg2, %arg1 : i32, i32
  }
  func.func @transform_2(%arg0: i32, %arg1: i32, %arg2: i32) -> (i32, i32) {
    %c0_i32 = arith.constant 0 : i32
    %c0_i32_0 = arith.constant 0 : i32
    return %c0_i32, %arg1 : i32, i32
  }
  func.func @transform_3(%arg0: i32, %arg1: i32, %arg2: i32) -> (i32, i32) {
    %c0_i32 = arith.constant 0 : i32
    return %arg0, %arg1 : i32, i32
  }
}

</mosaic_0001>

<bundles_post_ra>
// kernel: tpu_custom_call.1
= control target key start
LH: loop header
LB: loop body
LE: loop exit
PB: predicated region body
PF: predicated region fallthrough
CT: control target
= control target key end

     0   :  { %8 = vsyncpa [#allocation3], 0  ;;  %s1531_s0 = inlined_call_operand.hbm [shape: bf16[2048,128], index: 0, kind: input, shape index: {}]   ;;  %s1532_s1 = inlined_call_operand.hbm [shape: bf16[128,128], index: 1, kind: input, shape index: {}]   ;;  %s1533_s2 = inlined_call_operand.vmem [shape: f32[1,128], index: 2, kind: input, shape index: {}]   ;;  %s1534_s3 = inlined_call_operand.hbm [shape: f32[2048,128], index: 3, kind: output, shape index: {}]  }
   0x1   :  { %10 = vsyncpa [#allocation3 + $0x1], 0 }
   0x2   :  { %11 = vsyncpa [#allocation6], 0 }
   0x3   :  { %12 = vsyncpa [#allocation4], 0 }
   0x4   :  { %14 = vsyncpa [#allocation4 + $0x1], 0  ;;  %s1217_s12 = smov 0   ;;  %s1219_s13 = smov 0  }
   0x5   :  { %s1221_s14 = smov 0   ;;  %s1223_s15 = smov 0  }
   0x6   :  { %s1225_s16 = smov 0   ;;  %s1227_s17 = smov 0  }
   0x7 LB: > { %s810_s18 = sadd.s32 4294967295, %s1188_s17   ;;  %s811_s19 = sadd.s32 4294967294, %s1188_s17   ;;  %s1188_s17 = sphi %s1227_s17, %s20_s17   ;;  %s1184_s16 = sphi %s1225_s16, %s1557_s16   ;;  %s1180_s15 = sphi %s1223_s15, %s1556_s15   ;;  %s1176_s14 = sphi %s1221_s14, %s1555_s14   ;;  %s1172_s13 = sphi %s1219_s13, %s1554_s13   ;;  %s1168_s12 = sphi %s1217_s12, %s1553_s12  }
   0x8   : > { %p61_p0 = scmp.ne.s32.totalorder %s1172_s13, %s1168_s12  ;;  %p1251_p1 = scmp.eq.s32.totalorder %s810_s18, 0 }
   0x9   : > { %p1255_p2 = scmp.eq.s32.totalorder %s810_s18, 7  ;;  %p147_p3 = scmp.eq.s32.totalorder %s811_s19, 7 }
   0xa   : > { %s1539_s20 = scalar_select %p1251_p1, 1, 0 }
   0xb   : > { %s1540_s21 = scalar_select %p1255_p2, 1, 0 }
   0xc   : > { %p1261_p4 = por %p1251_p1, %p61_p0  ;;  %p812_p5 = scmp.ge.s32.totalorder %s1188_s17, 1 }
   0xd   : > { %p1266_p6 = por %p147_p3, %p61_p0  ;;  %p154_p7 = scmp.lt.s32.totalorder %s1188_s17, 9 }
   0xe   : > { %s1541_s22 = scalar_select %p1261_p4, 1, 0 }
   0xf   : > { %s1542_s23 = scalar_select %p1266_p6, 1, 0 }
  0x10   : > { %p1271_p8 = pnand %p812_p5, %p154_p7  ;;  %s1190_s25 = smov [#allocation5]  }
  0x11   : > { %s170_s26 = sshll.u32 %s1190_s25, 4  ;;  %s39_s28 = sadd.s32 1, %s1184_s16  ;;  %s171_s26 = int_to_ptr.vmem [resolvable:$true] %s170_s26 }
  0x12   : > { %s1543_s24 = scalar_select %p1271_p8, 1, 0 }
  0x13   : > { %p951_p9 = pneg %p1271_p8  ;;  %s1044_s4 = scalar_lea.hbm %s1532_s1, 1024 }
  0x14   : > { %p1045_p11 = scmp.ne.s32.totalorder %s1532_s1, %s1044_s4  ;;  %p1051_p3 = scmp.lt.u32.totalorder %s1044_s4, %s1532_s1 }
  0x15   : > { %p1279_p10 = pnand %p951_p9, %p1251_p1 }
  0x17   : > { %p1046_p12 = pneg %p1279_p10 }
  0x19   : > { %p1047_p13 = pnand %p1046_p12, %p1045_p11 }
  0x1b   : > { %p1048_p0 = pneg %p1047_p13 }
  0x1d   : > { %p1053_p5 = pnand %p1051_p3, %p1048_p0 }
  0x1f   : > { %1056 = shalt.err (!%p1053_p5)
}
  0x20   : > { %s1057_s9 = scalar_lea.vmem %s171_s26, 1024  ;;  %p1065_p1 = scmp.lt.s32.totalorder %s171_s26, %s171_s26 }
  0x21   : > { %p1058_p7 = scmp.ne.s32.totalorder %s171_s26, %s1057_s9  ;;  %p1066_p4 = scmp.lt.s32.totalorder %s1057_s9, %s1057_s9 }
  0x23   : > { %p1060_p9 = pnand %p1058_p7, %p1046_p12  ;;  %p1067_p8 = por %p1066_p4, %p1065_p1 }
  0x25   : > { %p1061_p6 = pneg %p1060_p9 }
  0x27   : > { %p1068_p2 = pnand %p1067_p8, %p1061_p6 }
  0x29   : > { %1071 = shalt.err (!%p1068_p2)
}
  0x2a   : > { %s1191_s10 = smov 64   ;;  %s1192_s11 = smov 4  }
  0x2b   : > { %954 = dma.hbm_to_vmem [thread:$0]  (!%p1279_p10), %s1532_s1, 1024, %s171_s26, [#allocation6], %s1191_s10, %s1191_s10, %s1192_s11  }
  0x2c   : > { %p41_p1 = scmp.ge.s32.totalorder %s39_s28, 8  ;;  %s48_s25 = sadd.s32 1, %s1176_s14 }
  0x2d   : > { %p55_p2 = scmp.ne.s32.totalorder %s1176_s14, %s1172_s13  ;;  %p56_p4 = scmp.eq.s32.totalorder %s1188_s17, 0 }
  0x2e   : > { %s1559_s28 = smov (%p41_p1, %s39_s28), 0  ;;  %p1546_p8 = scmp.ne.s32.totalorder %s1540_s21, 0 }
  0x2f   : > { %p1309_p6 = por %p56_p4, %p55_p2  ;;  %s43_s30 = ssub.s32 %s1184_s16, %s1559_s28 }
  0x30   : > { %p1315_p11 = por %p1546_p8, %p55_p2  ;;  %p964_p12 = scmp.lt.s32.totalorder %s1188_s17, 8 }
  0x31   : > { %p46_p10 = scmp.eq.s32.totalorder %s43_s30, 0  ;;  %s190_s26 = sand.u32 1, %s1176_s14  }
  0x32   : > { %s816_s4 = sshll.u32 %s190_s26, 7  ;;  %s853_s6 = sshll.u32 %s1184_s16, 11 }
  0x33   : > { %s1324_s5 = scalar_select %p46_p10, %s1176_s14, %s48_s25  }
  0x34   : > { %s1330_s9 = scalar_lea.hbm %s1531_s0, %s853_s6  ;;  %s194_s21 = scalar_lea.vmem [#allocation2], %s816_s4 }
  0x35   : > { %s202_s18 = sshll.u32 %s194_s21, 4  ;;  %p1336_p13 = pnand %p964_p12, %p1309_p6  ;;  %s1332_s18 = int_to_ptr.vmem [resolvable:$true] %s202_s18 }
  0x36   : > { %s1340_s25 = scalar_lea.sflag [#allocation3], %s190_s26  ;;  %s1072_s30 = scalar_lea.hbm %s1330_s9, 2048 }
  0x37   : > { %p1073_p0 = scmp.ne.s32.totalorder %s1330_s9, %s1072_s30  ;;  %p1074_p3 = pneg %p1336_p13 }
  0x38   : > { %s1077_s29 = scalar_lea.hbm %s1531_s0, 16384  ;;  %p1078_p9 = scmp.lt.u32.totalorder %s1330_s9, %s1531_s0 }
  0x39   : > { %p1075_p5 = pnand %p1074_p3, %p1073_p0  ;;  %p1079_p1 = scmp.lt.u32.totalorder %s1077_s29, %s1072_s30 }
  0x3a   : > { %p1081_p4 = scmp.lt.u32.totalorder %s1072_s30, %s1330_s9 }
  0x3b   : > { %p1076_p7 = pneg %p1075_p5  ;;  %p1080_p2 = por %p1079_p1, %p1078_p9 }
  0x3d   : > { %p1082_p6 = por %p1081_p4, %p1080_p2 }
  0x3f   : > { %p1083_p8 = pnand %p1082_p6, %p1076_p7 }
  0x41   : > { %1086 = shalt.err (!%p1083_p8)
}
  0x42   : > { %s1087_s26 = scalar_lea.vmem %s1332_s18, 2048  ;;  %s1193_s21 = smov [#allocation2]  }
  0x43   : > { %p1088_p12 = scmp.ne.s32.totalorder %s1332_s18, %s1087_s26  ;;  %s1092_s4 = sshll.u32 %s1193_s21, 4  ;;  %s1093_s4 = int_to_ptr.vmem [resolvable:$false] %s1092_s4 }
  0x44   : > { %s1094_s6 = scalar_lea.vmem %s1093_s4, 4096  ;;  %p1095_p5 = scmp.lt.s32.totalorder %s1332_s18, %s1093_s4 }
  0x45   : > { %p1090_p10 = pnand %p1088_p12, %p1074_p3  ;;  %p1096_p9 = scmp.lt.s32.totalorder %s1094_s6, %s1087_s26 }
  0x47   : > { %p1091_p0 = pneg %p1090_p10  ;;  %p1097_p1 = por %p1096_p9, %p1095_p5 }
  0x49   : > { %p1098_p2 = pnand %p1097_p1, %p1091_p0 }
  0x4b   : > { %1101 = shalt.err (!%p1098_p2)
}
  0x4c   : > { %958 = dma.hbm_to_vmem [thread:$0]  (!%p1336_p13), %s1330_s9, 2048, %s1332_s18, %s1340_s25, %s1191_s10, %s1191_s10, %s1192_s11  }
  0x4d   : > { %p1549_p3 = scmp.ne.s32.totalorder %s1543_s24, 0 }
  0x4e   : > { %s1374_s30 = sand.u32 (!%p1549_p3), 1, %s1172_s13   ;;  %p1550_p7 = scmp.ne.s32.totalorder (!%p1549_p3), %s1541_s22, 0 }
  0x4f   : > { %214 = sbr.rel (%p1549_p3) target bundleno = 381 (0x17d), region = 32  ;;  %s820_s29 = sshll.u32 (!%p1549_p3), %s1374_s30, 7 }
  0x50   : > { %s217_s7 = scalar_lea.sflag (!%p1549_p3), [#allocation3], %s1374_s30  ;;  %s1378_s8 = scalar_lea.vmem (!%p1549_p3), [#allocation2], %s820_s29 }
  0x56   : > { %1155 = dma.done.wait (%p1550_p7), %s217_s7, 2048  }
  0x57   : > { %1157 = vsyncadd (%p1550_p7), %s217_s7, 4294965248  ;;  %p1551_p13 = scmp.ne.s32.totalorder %s1539_s20, 0 }
  0x59   : > { %1159 = dma.done.wait (%p1551_p13), [#allocation6], 1024  }
  0x5a   : > { %1161 = vsyncadd (%p1551_p13), [#allocation6], 4294966272  ;;  %v1020_v0 = vld [vmem:[#allocation5] sm:$0xff]   ;;  %v1021_v1 = vld [vmem:[#allocation5 + $0x8] sm:$0xff]   ;;  %s822_s24 = sshll.u32 %s1374_s30, 8  ;;  %s854_s11 = sshll.u32 %s1180_s15, 12 }
  0x5b   : > { %879 = vmatprep.subr.bf16.mxu0 %v1020_v0  ;;  %927 = vmatprep.subr.bf16.mxu1 %v1020_v0  ;;  %v1022_v2 = vld [vmem:[#allocation5 + $0x10] sm:$0xff]   ;;  %v1023_v3 = vld [vmem:[#allocation5 + $0x18] sm:$0xff]   ;;  %v1028_v4 = vld [vmem:[%s1378_s8] sm:$0xff]   ;;  %s1418_s10 = scalar_lea.vmem [#allocation7], %s822_s24  ;;  %s1475_s19 = scalar_lea.hbm %s1534_s3, %s854_s11 }
  0x5c   : > { %880 = vmatpush3.bf16.msra.mxu0 %v1020_v0  ;;  %935 = vmatpush3.bf16.msra.mxu1 %v1020_v0  ;;  %v1029_v5 = vld [vmem:[%s1378_s8 + $0x40] sm:$0xff]   ;;  %v1025_v7 = vld [vmem:[#allocation5 + $0x28] sm:$0xff]   ;;  %v1026_v8 = vld [vmem:[#allocation5 + $0x30] sm:$0xff]   ;;  %s696_s9 = sshll.u32 %s1418_s10, 4  ;;  %s682_s25 = scalar_lea.sflag [#allocation4], %s1374_s30  ;;  %s1477_s9 = int_to_ptr.vmem [resolvable:$true] %s696_s9 }
  0x5d   : > { %881 = vmatprep.subr.bf16.mxu0 %v1021_v1  ;;  %928 = vmatprep.subr.bf16.mxu1 %v1021_v1  ;;  %v1024_v6 = vld [vmem:[#allocation5 + $0x20] sm:$0xff]   ;;  %v1027_v9 = vld [vmem:[#allocation5 + $0x38] sm:$0xff]   ;;  %v1030_v10 = vld [vmem:[%s1378_s8 + $0x8] sm:$0xff]   ;;  %s1102_s26 = scalar_lea.vmem %s1477_s9, 4096  ;;  %s1194_s21 = smov [#allocation7]  }
  0x5e   : > { %895 = vmatprep.mubr.bf16.mxu0 %v1028_v4  ;;  %911 = vmatprep.mubr.bf16.mxu1 %v1029_v5  ;;  %v1031_v11 = vld [vmem:[%s1378_s8 + $0x48] sm:$0xff]   ;;  %v1032_v12 = vld [vmem:[%s1378_s8 + $0x10] sm:$0xff]   ;;  %v1034_v14 = vld [vmem:[%s1378_s8 + $0x18] sm:$0xff]   ;;  %p1103_p4 = scmp.ne.s32.totalorder %s1477_s9, %s1102_s26  ;;  %s1106_s4 = sshll.u32 %s1194_s21, 4  ;;  %s1107_s4 = int_to_ptr.vmem [resolvable:$false] %s1106_s4 }
  0x5f   : > { %v1033_v13 = vld [vmem:[%s1378_s8 + $0x50] sm:$0xff]   ;;  %v1035_v15 = vld [vmem:[%s1378_s8 + $0x58] sm:$0xff]   ;;  %v1036_v16 = vld [vmem:[%s1378_s8 + $0x20] sm:$0xff]   ;;  %s1108_s6 = scalar_lea.vmem %s1107_s4, 8192  ;;  %p1109_p12 = scmp.lt.s32.totalorder %s1477_s9, %s1107_s4 }
  0x60   : > { %882 = vmatpush3.bf16.msra.mxu0 %v1021_v1  ;;  %936 = vmatpush3.bf16.msra.mxu1 %v1021_v1  ;;  %v1037_v17 = vld [vmem:[%s1378_s8 + $0x60] sm:$0xff]   ;;  %v1038_v18 = vld [vmem:[%s1378_s8 + $0x28] sm:$0xff]   ;;  %v1040_v20 = vld [vmem:[%s1378_s8 + $0x30] sm:$0xff]   ;;  %p1104_p6 = pnand %p1103_p4, %p1315_p11  ;;  %p1110_p10 = scmp.lt.s32.totalorder %s1108_s6, %s1102_s26 }
  0x61   : > { %883 = vmatprep.subr.bf16.mxu0 %v1022_v2  ;;  %929 = vmatprep.subr.bf16.mxu1 %v1022_v2  ;;  %v1039_v19 = vld [vmem:[%s1378_s8 + $0x68] sm:$0xff]   ;;  %v1041_v21 = vld [vmem:[%s1378_s8 + $0x70] sm:$0xff]   ;;  %v1042_v22 = vld [vmem:[%s1378_s8 + $0x38] sm:$0xff]  }
  0x62   : > { %v1043_v23 = vld [vmem:[%s1378_s8 + $0x78] sm:$0xff]   ;;  %v1407_v24 = vld [vmem:[%s1533_s2] ss:$0 sm:$0xff]  ;;  %p1105_p8 = pneg %p1104_p6  ;;  %p1111_p0 = por %p1110_p10, %p1109_p12 }
  0x64   : > { %884 = vmatpush3.bf16.msra.mxu0 %v1022_v2  ;;  %937 = vmatpush3.bf16.msra.mxu1 %v1022_v2  ;;  %p1112_p5 = pnand %p1111_p0, %p1105_p8 }
  0x65   : > { %885 = vmatprep.subr.bf16.mxu0 %v1023_v3  ;;  %930 = vmatprep.subr.bf16.mxu1 %v1023_v3 }
  0x68   : > { %886 = vmatpush3.bf16.msra.mxu0 %v1023_v3  ;;  %938 = vmatpush3.bf16.msra.mxu1 %v1023_v3 }
  0x69   : > { %887 = vmatprep.subr.bf16.mxu0 %v1024_v6  ;;  %931 = vmatprep.subr.bf16.mxu1 %v1024_v6 }
  0x6c   : > { %888 = vmatpush3.bf16.msra.mxu0 %v1024_v6  ;;  %939 = vmatpush3.bf16.msra.mxu1 %v1024_v6 }
  0x6d   : > { %889 = vmatprep.subr.bf16.mxu0 %v1025_v7  ;;  %932 = vmatprep.subr.bf16.mxu1 %v1025_v7 }
  0x70   : > { %890 = vmatpush3.bf16.msra.mxu0 %v1025_v7  ;;  %940 = vmatpush3.bf16.msra.mxu1 %v1025_v7 }
  0x71   : > { %891 = vmatprep.subr.bf16.mxu0 %v1026_v8  ;;  %933 = vmatprep.subr.bf16.mxu1 %v1026_v8 }
  0x74   : > { %892 = vmatpush3.bf16.msra.mxu0 %v1026_v8  ;;  %941 = vmatpush3.bf16.msra.mxu1 %v1026_v8 }
  0x75   : > { %893 = vmatprep.subr.bf16.mxu0 %v1027_v9  ;;  %934 = vmatprep.subr.bf16.mxu1 %v1027_v9 }
  0x78   : > { %894 = vmatpush3.bf16.msra.mxu0 %v1027_v9  ;;  %942 = vmatpush3.bf16.msra.mxu1 %v1027_v9 }
  0x7b   : > { %896 = vmatmul.mubr.bf16.vlgmr.msra.gmra.mrb[0].mxu0 %v1030_v10  ;;  %912 = vmatmul.mubr.bf16.vlgmr.msra.gmra.mrb[0].mxu1 %v1031_v11 }
  0x7c   : > { %899 = vmatprep.mubr.bf16.mxu0 %v1032_v12  ;;  %915 = vmatprep.mubr.bf16.mxu1 %v1033_v13 }
  0x83   : > { %900 = vmatmul.mubr.bf16.gmra.mrb[4].mxu0 %v1034_v14  ;;  %916 = vmatmul.mubr.bf16.gmra.mrb[4].mxu1 %v1035_v15 }
  0x84   : > { %903 = vmatprep.mubr.bf16.mxu0 %v1036_v16  ;;  %919 = vmatprep.mubr.bf16.mxu1 %v1037_v17 }
  0x8b   : > { %904 = vmatmul.mubr.bf16.gmra.mrb[8].mxu0 %v1038_v18  ;;  %920 = vmatmul.mubr.bf16.gmra.mrb[8].mxu1 %v1039_v19 }
  0x8c   : > { %907 = vmatprep.mubr.bf16.mxu0 %v1040_v20  ;;  %923 = vmatprep.mubr.bf16.mxu1 %v1041_v21 }
  0x93   : > { %908 = vmatmul.mubr.bf16.gmra.mrb[12].mxu0 %v1042_v22  ;;  %924 = vmatmul.mubr.bf16.gmra.mrb[12].mxu1 %v1043_v23 }
 0x14e   : > { %v897_v25 = vpop.f32.mrb[0].mxu0  ;;  %v913_v26 = vpop.f32.mrb[0].mxu1 }
 0x14f   : > { %v499_v27 = vadd.f32 %v897_v25, %v1407_v24  ;;  %v563_v28 = vadd.f32 %v913_v26, %v1407_v24  ;;  %v490_v29 = vpop.f32.mrb[1].mxu0  ;;  %v554_v30 = vpop.f32.mrb[1].mxu1 }
 0x150   : > { %v491_v31 = vadd.f32 %v1407_v24, %v490_v29  ;;  %v555_v32 = vadd.f32 %v1407_v24, %v554_v30  ;;  %v898_v33 = vpop.f32.mrb[2].mxu0  ;;  %v914_v34 = vpop.f32.mrb[2].mxu1 }
 0x151   : > { %v619_v35 = vmax.f32 %v499_v27, 0.0  ;;  %v635_v36 = vmax.f32 %v563_v28, 0.0  ;;  %v502_v37 = vadd.f32 %v898_v33, %v1407_v24  ;;  %v566_v38 = vadd.f32 %v914_v34, %v1407_v24  ;;  %v493_v39 = vpop.f32.mrb[3].mxu0  ;;  %v557_v40 = vpop.f32.mrb[3].mxu1 }
 0x152   : > { %v617_v41 = vmax.f32 %v491_v31, 0.0  ;;  %v633_v42 = vmax.f32 %v555_v32, 0.0  ;;  %v494_v43 = vadd.f32 %v1407_v24, %v493_v39  ;;  %v558_v44 = vadd.f32 %v1407_v24, %v557_v40 }
 0x153   : > { %651 = vst [vmem:[%s1418_s10 + $0x10] sm:$0xff] %v619_v35  ;;  %667 = vst [vmem:[%s1418_s10 + $0x90] sm:$0xff] %v635_v36  ;;  %v620_v45 = vmax.f32 %v502_v37, 0.0  ;;  %v636_v46 = vmax.f32 %v566_v38, 0.0 }
 0x154   : > { %649 = vst [vmem:[%s1418_s10] sm:$0xff] %v617_v41  ;;  %665 = vst [vmem:[%s1418_s10 + $0x80] sm:$0xff] %v633_v42  ;;  %v618_v47 = vmax.f32 %v494_v43, 0.0  ;;  %v634_v48 = vmax.f32 %v558_v44, 0.0 }
 0x155   : > { %652 = vst [vmem:[%s1418_s10 + $0x18] sm:$0xff] %v620_v45  ;;  %668 = vst [vmem:[%s1418_s10 + $0x98] sm:$0xff] %v636_v46 }
 0x156   : > { %650 = vst [vmem:[%s1418_s10 + $0x8] sm:$0xff] %v618_v47  ;;  %666 = vst [vmem:[%s1418_s10 + $0x88] sm:$0xff] %v634_v48  ;;  %v901_v49 = vpop.f32.mrb[4].mxu0  ;;  %v917_v50 = vpop.f32.mrb[4].mxu1 }
 0x157   : > { %v515_v51 = vadd.f32 %v901_v49, %v1407_v24  ;;  %v579_v52 = vadd.f32 %v917_v50, %v1407_v24  ;;  %v506_v53 = vpop.f32.mrb[5].mxu0  ;;  %v570_v54 = vpop.f32.mrb[5].mxu1 }
 0x158   : > { %v507_v55 = vadd.f32 %v1407_v24, %v506_v53  ;;  %v571_v56 = vadd.f32 %v1407_v24, %v570_v54  ;;  %v902_v57 = vpop.f32.mrb[6].mxu0  ;;  %v918_v58 = vpop.f32.mrb[6].mxu1 }
 0x159   : > { %v623_v59 = vmax.f32 %v515_v51, 0.0  ;;  %v639_v60 = vmax.f32 %v579_v52, 0.0  ;;  %v518_v61 = vadd.f32 %v902_v57, %v1407_v24  ;;  %v582_v62 = vadd.f32 %v918_v58, %v1407_v24  ;;  %v509_v63 = vpop.f32.mrb[7].mxu0  ;;  %v573_v0 = vpop.f32.mrb[7].mxu1 }
 0x15a   : > { %v621_v1 = vmax.f32 %v507_v55, 0.0  ;;  %v637_v2 = vmax.f32 %v571_v56, 0.0  ;;  %v510_v3 = vadd.f32 %v1407_v24, %v509_v63  ;;  %v574_v4 = vadd.f32 %v1407_v24, %v573_v0 }
 0x15b   : > { %655 = vst [vmem:[%s1418_s10 + $0x30] sm:$0xff] %v623_v59  ;;  %671 = vst [vmem:[%s1418_s10 + $0xb0] sm:$0xff] %v639_v60  ;;  %v624_v5 = vmax.f32 %v518_v61, 0.0  ;;  %v640_v6 = vmax.f32 %v582_v62, 0.0 }
 0x15c   : > { %653 = vst [vmem:[%s1418_s10 + $0x20] sm:$0xff] %v621_v1  ;;  %669 = vst [vmem:[%s1418_s10 + $0xa0] sm:$0xff] %v637_v2  ;;  %v622_v7 = vmax.f32 %v510_v3, 0.0  ;;  %v638_v8 = vmax.f32 %v574_v4, 0.0 }
 0x15d   : > { %656 = vst [vmem:[%s1418_s10 + $0x38] sm:$0xff] %v624_v5  ;;  %672 = vst [vmem:[%s1418_s10 + $0xb8] sm:$0xff] %v640_v6 }
 0x15e   : > { %654 = vst [vmem:[%s1418_s10 + $0x28] sm:$0xff] %v622_v7  ;;  %670 = vst [vmem:[%s1418_s10 + $0xa8] sm:$0xff] %v638_v8  ;;  %v905_v9 = vpop.f32.mrb[8].mxu0  ;;  %v921_v10 = vpop.f32.mrb[8].mxu1 }
 0x15f   : > { %v531_v11 = vadd.f32 %v905_v9, %v1407_v24  ;;  %v595_v12 = vadd.f32 %v921_v10, %v1407_v24  ;;  %v522_v13 = vpop.f32.mrb[9].mxu0  ;;  %v586_v14 = vpop.f32.mrb[9].mxu1 }
 0x160   : > { %v523_v15 = vadd.f32 %v1407_v24, %v522_v13  ;;  %v587_v16 = vadd.f32 %v1407_v24, %v586_v14  ;;  %v906_v17 = vpop.f32.mrb[10].mxu0  ;;  %v922_v18 = vpop.f32.mrb[10].mxu1 }
 0x161   : > { %v627_v19 = vmax.f32 %v531_v11, 0.0  ;;  %v643_v20 = vmax.f32 %v595_v12, 0.0  ;;  %v534_v21 = vadd.f32 %v906_v17, %v1407_v24  ;;  %v598_v22 = vadd.f32 %v922_v18, %v1407_v24  ;;  %v525_v23 = vpop.f32.mrb[11].mxu0  ;;  %v589_v25 = vpop.f32.mrb[11].mxu1 }
 0x162   : > { %v625_v26 = vmax.f32 %v523_v15, 0.0  ;;  %v641_v27 = vmax.f32 %v587_v16, 0.0  ;;  %v526_v28 = vadd.f32 %v1407_v24, %v525_v23  ;;  %v590_v29 = vadd.f32 %v1407_v24, %v589_v25 }
 0x163   : > { %659 = vst [vmem:[%s1418_s10 + $0x50] sm:$0xff] %v627_v19  ;;  %675 = vst [vmem:[%s1418_s10 + $0xd0] sm:$0xff] %v643_v20  ;;  %v628_v30 = vmax.f32 %v534_v21, 0.0  ;;  %v644_v31 = vmax.f32 %v598_v22, 0.0 }
 0x164   : > { %657 = vst [vmem:[%s1418_s10 + $0x40] sm:$0xff] %v625_v26  ;;  %673 = vst [vmem:[%s1418_s10 + $0xc0] sm:$0xff] %v641_v27  ;;  %v626_v32 = vmax.f32 %v526_v28, 0.0  ;;  %v642_v33 = vmax.f32 %v590_v29, 0.0 }
 0x165   : > { %660 = vst [vmem:[%s1418_s10 + $0x58] sm:$0xff] %v628_v30  ;;  %676 = vst [vmem:[%s1418_s10 + $0xd8] sm:$0xff] %v644_v31 }
 0x166   : > { %658 = vst [vmem:[%s1418_s10 + $0x48] sm:$0xff] %v626_v32  ;;  %674 = vst [vmem:[%s1418_s10 + $0xc8] sm:$0xff] %v642_v33  ;;  %v909_v34 = vpop.f32.mrb[12].mxu0  ;;  %v925_v35 = vpop.f32.mrb[12].mxu1 }
 0x167   : > { %v547_v36 = vadd.f32 %v909_v34, %v1407_v24  ;;  %v611_v37 = vadd.f32 %v925_v35, %v1407_v24  ;;  %v538_v38 = vpop.f32.mrb[13].mxu0  ;;  %v602_v39 = vpop.f32.mrb[13].mxu1 }
 0x168   : > { %v539_v40 = vadd.f32 %v1407_v24, %v538_v38  ;;  %v603_v41 = vadd.f32 %v1407_v24, %v602_v39  ;;  %v910_v42 = vpop.f32.mrb[14].mxu0  ;;  %v926_v43 = vpop.f32.mrb[14].mxu1 }
 0x169   : > { %v631_v44 = vmax.f32 %v547_v36, 0.0  ;;  %v647_v45 = vmax.f32 %v611_v37, 0.0  ;;  %v550_v46 = vadd.f32 %v910_v42, %v1407_v24  ;;  %v614_v47 = vadd.f32 %v926_v43, %v1407_v24  ;;  %v541_v48 = vpop.f32.mrb[15].mxu0  ;;  %v605_v49 = vpop.f32.mrb[15].mxu1 }
 0x16a   : > { %v629_v50 = vmax.f32 %v539_v40, 0.0  ;;  %v645_v51 = vmax.f32 %v603_v41, 0.0  ;;  %v542_v52 = vadd.f32 %v1407_v24, %v541_v48  ;;  %v606_v53 = vadd.f32 %v1407_v24, %v605_v49 }
 0x16b   : > { %663 = vst [vmem:[%s1418_s10 + $0x70] sm:$0xff] %v631_v44  ;;  %679 = vst [vmem:[%s1418_s10 + $0xf0] sm:$0xff] %v647_v45  ;;  %v632_v54 = vmax.f32 %v550_v46, 0.0  ;;  %v648_v55 = vmax.f32 %v614_v47, 0.0 }
 0x16c   : > { %661 = vst [vmem:[%s1418_s10 + $0x60] sm:$0xff] %v629_v50  ;;  %677 = vst [vmem:[%s1418_s10 + $0xe0] sm:$0xff] %v645_v51  ;;  %v630_v56 = vmax.f32 %v542_v52, 0.0  ;;  %v646_v57 = vmax.f32 %v606_v53, 0.0 }
 0x16d   : > { %664 = vst [vmem:[%s1418_s10 + $0x78] sm:$0xff] %v632_v54  ;;  %680 = vst [vmem:[%s1418_s10 + $0xf8] sm:$0xff] %v648_v55 }
 0x16e   : > { %662 = vst [vmem:[%s1418_s10 + $0x68] sm:$0xff] %v630_v56  ;;  %678 = vst [vmem:[%s1418_s10 + $0xe8] sm:$0xff] %v646_v57 }
 0x16f   : > { %1115 = shalt.err (!%p1112_p5)
}
 0x170   : > { %s1116_s29 = scalar_lea.hbm %s1475_s19, 4096  ;;  %s1120_s20 = scalar_lea.hbm %s1534_s3, 32768 }
 0x171   : > { %p1117_p9 = scmp.ne.s32.totalorder %s1475_s19, %s1116_s29  ;;  %p1121_p3 = scmp.lt.u32.totalorder %s1475_s19, %s1534_s3 }
 0x172   : > { %p1122_p7 = scmp.lt.u32.totalorder %s1120_s20, %s1116_s29  ;;  %p1124_p4 = scmp.lt.u32.totalorder %s1116_s29, %s1475_s19 }
 0x173   : > { %p1118_p1 = pnand %p1117_p9, %p1315_p11 }
 0x174   : > { %p1123_p13 = por %p1122_p7, %p1121_p3 }
 0x175   : > { %p1119_p2 = pneg %p1118_p1 }
 0x176   : > { %p1125_p6 = por %p1124_p4, %p1123_p13 }
 0x178   : > { %p1126_p8 = pnand %p1125_p6, %p1119_p2 }
 0x17a   : > { %1129 = shalt.err (!%p1126_p8)
}
 0x17b   : > { %s1195_s10 = smov 128   ;;  %s1196_s11 = smov 8  }
 0x17c   : > { %949 = dma.vmem_to_hbm [thread:$0]  (%p1315_p11), %s1477_s9, 4096, %s1475_s19, %s682_s25, %s1195_s10, %s1195_s10, %s1196_s11  }
 0x17d PF: > { %p966_p12 = scmp.ge.s32.totalorder %s1188_s17, 2  ;;  %s711_s15 = sand.u32 1, %s1168_s12  }
 0x17e   : > { %p1552_p10 = scmp.ne.s32.totalorder %s1542_s23, 0  ;;  %s712_s18 = scalar_lea.sflag [#allocation4], %s711_s15 }
 0x180   : > { %p960_p0 = pnand %p966_p12, %p1552_p10 }
 0x182   : > { %1163 = dma.done.wait (!%p960_p0), %s712_s18, 4096  }
 0x183   : > { %1165 = vsyncadd (!%p960_p0), %s712_s18, 4294963200  ;;  %s20_s17 = sadd.s32 1, %s1188_s17   ;;  %s1553_s12 = smov %s1172_s13 }
 0x184   : > { %p17_p5 = scmp.ge.s32.totalorder %s20_s17, 10   ;;  %s1554_s13 = smov %s1176_s14 }
 0x185   : > { %s1555_s14 = smov %s1324_s5  ;;  %s1556_s15 = smov %s1184_s16 }
 0x186   : > { %s1557_s16 = smov %s1559_s28  ;;  %19 = sbr.rel (!%p17_p5) target bundleno = 7 (0x7), region = 85 }
 0x18d   :  { %717 = vsyncpa [#allocation3], 1 }
 0x18e   :  { %719 = vsyncpa [#allocation3 + $0x1], 1 }
 0x18f   :  { %720 = vsyncpa [#allocation6], 1 }
 0x190   :  { %721 = vsyncpa [#allocation4], 1 }
 0x191   :  { %723 = vsyncpa [#allocation4 + $0x1], 1 }

</bundles_post_ra>
